<compile_context>
chip_gen: v7x
topology: tpu7x:2x2x1
jax: 0.10.0
libtpu: 0.0.40
codegen_flags: <defaults>
</compile_context>

<pallas_src>
import functools
import math

import jax
import jax.numpy as jnp
from jax.experimental import pallas as pl
from jax.experimental.pallas import tpu as pltpu

LEAKY_SLOPE = 0.01  # nn.LeakyReLU default negative_slope
LANE = 128
SUBLANE = 8


def _round_up(v, m):
    return (v + m - 1) // m * m


def _mlp_kernel(n_layers, out_dim, write_q, x_ref, *refs):
    """Fused MLP forward: (Linear -> LeakyReLU) * (n-1) -> Linear [-> argmax].

    refs = (w_0, b_0, ..., w_{n-1}, b_{n-1}, out_ref)
    x / weights are bf16 (MXU-native); accumulation and epilogue are f32 (VPU).
    out_ref is either the padded Q block (write_q=True) or the greedy action.
    """
    out_ref = refs[-1]
    param_refs = refs[:-1]

    h = x_ref[...]                                      # bf16 [tb, in_p]
    acc = None
    for i in range(n_layers):
        w = param_refs[2 * i][...]                      # bf16 [in_p_i, out_p_i]
        b = param_refs[2 * i + 1][...]                  # f32  [1, out_p_i]
        acc = jnp.dot(h, w, preferred_element_type=jnp.float32) + b
        if i < n_layers - 1:                            # LeakyReLU, f32 on VPU
            acc = jnp.where(acc >= 0, acc, LEAKY_SLOPE * acc)
            h = acc.astype(jnp.bfloat16)                # bf16 for the next MXU op

    if write_q:
        # Lane-dense [tb, out_p] store (out_p is a multiple of 128).
        out_ref[...] = acc.astype(out_ref.dtype)
    else:
        # Greedy action only (env-step path): argmax over real (non-padded) lanes.
        # TODO(synk): the (tb,1) int32 store is a masked vst; could be made
        # lane-dense with a sublane->lane transpose, but writeback is 4 B/row.
        lane_idx = jax.lax.broadcasted_iota(jnp.int32, acc.shape, 1)
        q_masked = jnp.where(lane_idx < out_dim, acc, -jnp.inf)
        row_max = jnp.max(q_masked, axis=-1, keepdims=True)
        best = jnp.min(jnp.where(q_masked == row_max, lane_idx, acc.shape[1]),
                       axis=-1, keepdims=True)
        out_ref[...] = best.astype(jnp.int32)


def dqn_forward(x, params, *, batch_tile=None, q_dtype=jnp.float32, compute_q=True):
    """DQNAgent MLP forward as one fused Pallas kernel.

    x:      [B, input_dim] (any float dtype)
    params: list of (W, b) with W: [in_i, out_i], b: [1, out_i] (f32, unpadded)
    Returns (q_values [B, out_dim] q_dtype or None, greedy_action [B] int32).
    """
    B, in_dim = x.shape
    n_layers = len(params)
    out_dim = params[-1][0].shape[1]

    # --- pad params once: lanes to 128, weights in bf16, biases in f32 ---------
    in_p = _round_up(in_dim, LANE)
    flat_params = []
    param_bytes = 0
    for w, b in params:
        fi, fo = w.shape
        fi_p, fo_p = _round_up(fi, LANE), _round_up(fo, LANE)
        w_p = jnp.zeros((fi_p, fo_p), jnp.bfloat16).at[:fi, :fo].set(
            w.astype(jnp.bfloat16))
        b_p = jnp.zeros((1, fo_p), jnp.float32).at[:, :fo].set(
            b.astype(jnp.float32))
        flat_params += [w_p, b_p]
        param_bytes += w_p.size * 2 + b_p.size * 4
    out_p = flat_params[-2].shape[1]
    q_elem_bytes = jnp.dtype(q_dtype).itemsize
    # NOTE: on v6e/v7x (2x256x256 MXU) hidden dims that are multiples of 256 fill
    # the MXU better; 128-multiples are already a perfect match on v5e.

    # --- batch tile: >=2 grid steps for v7x megacore, fat tiles for v5e/v6e ----
    if batch_tile is None:
        if B >= 16:
            tb = min(_round_up(pl.cdiv(B, 2), SUBLANE), 512)
        else:
            tb = _round_up(max(B, 1), SUBLANE)
    else:
        tb = _round_up(batch_tile, SUBLANE)

    def vmem_needed(tb_, param_bufs):
        vm = param_bufs * param_bytes              # resident weights/biases
        vm += 2 * tb_ * in_p * 2                   # double-buffered bf16 x block
        if compute_q:
            vm += 2 * tb_ * out_p * q_elem_bytes   # double-buffered q block
        else:
            vm += 2 * tb_ * 4                      # double-buffered action block
        return vm

    try:
        phys_vmem = int(pltpu.get_tpu_info().vmem_capacity_bytes)
    except Exception:
        phys_vmem = 64 << 20                       # conservative (v7x per-TC)
    budget = int(phys_vmem * 0.9)
    while tb > SUBLANE and vmem_needed(tb, 1) > budget:
        tb = _round_up(tb // 2, SUBLANE)
    # TODO(synk): if even tb=8 exceeds the budget (huge flattened observations),
    # add a K grid axis ("arbitrary") with an f32 VMEM accumulator for layer 0.

    B_pad = _round_up(B, tb)
    x_p = jnp.zeros((B_pad, in_p), jnp.bfloat16).at[:B, :in_dim].set(
        x.astype(jnp.bfloat16))

    kernel = functools.partial(_mlp_kernel, n_layers, out_dim, compute_q)

    def run(param_bufs):
        pm = pl.Buffered(param_bufs) if param_bufs is not None else None
        param_specs = []
        for arr in flat_params:
            if pm is not None:
                param_specs.append(
                    pl.BlockSpec(arr.shape, lambda i: (0, 0), pipeline_mode=pm))
            else:
                param_specs.append(pl.BlockSpec(arr.shape, lambda i: (0, 0)))
        if compute_q:
            out_shape = jax.ShapeDtypeStruct((B_pad, out_p), q_dtype)
            out_spec = pl.BlockSpec((tb, out_p), lambda i: (i, 0))
        else:
            out_shape = jax.ShapeDtypeStruct((B_pad, 1), jnp.int32)
            out_spec = pl.BlockSpec((tb, 1), lambda i: (i, 0))
        bufs = param_bufs if param_bufs is not None else 2
        vmem_limit = min(
            max(int(vmem_needed(tb, bufs) * 1.25) + (2 << 20), 16 << 20),
            phys_vmem)
        return pl.pallas_call(
            kernel,
            out_shape=out_shape,
            grid_spec=pltpu.PrefetchScalarGridSpec(
                num_scalar_prefetch=0,
                grid=(B_pad // tb,),
                in_specs=[pl.BlockSpec((tb, in_p), lambda i: (i, 0))] + param_specs,
                out_specs=out_spec,
            ),
            compiler_params=pltpu.CompilerParams(
                dimension_semantics=("parallel",),
                vmem_limit_bytes=vmem_limit),
        )(x_p, *flat_params)

    try:
        out = run(1)      # single-buffered resident params (preferred)
    except Exception:
        out = run(None)   # fallback: default double-buffering

    if compute_q:
        q = out[:B, :out_dim]
        act = jnp.argmax(q, axis=-1).astype(jnp.int32)
        return q, act
    return None, out[:B, 0]


def init_params(key, input_dim, hidden_layers, output_dim):
    """Deterministic init mirroring nn.Linear's uniform(-1/sqrt(fan_in), +)."""
    dims = [input_dim] + list(hidden_layers) + [output_dim]
    params = []
    for i in range(len(dims) - 1):
        fan_in, fan_out = dims[i], dims[i + 1]
        key, kw, kb = jax.random.split(key, 3)
        bound = 1.0 / math.sqrt(fan_in)
        w = jax.random.uniform(kw, (fan_in, fan_out), jnp.float32, -bound, bound)
        b = jax.random.uniform(kb, (1, fan_out), jnp.float32, -bound, bound)
        params.append((w, b))
    return params


def reference_forward(x, params):
    """Pure-JAX reference with the same numerics (bf16 matmul inputs, f32 acc)."""
    h = x.astype(jnp.float32)
    for i, (w, b) in enumerate(params):
        h = jnp.dot(h.astype(jnp.bfloat16), w.astype(jnp.bfloat16),
                    preferred_element_type=jnp.float32) + b.astype(jnp.float32)
        if i < len(params) - 1:
            h = jnp.where(h >= 0, h, LEAKY_SLOPE * h)
    return h


if __name__ == "__main__":
    key = jax.random.PRNGKey(0)
    B = 8
    input_dim = 32
    hidden_layers = [64, 64]
    output_dim = 6

    key, kx = jax.random.split(key)
    x = jax.random.normal(kx, (B, input_dim), jnp.float32)
    params = init_params(key, input_dim, hidden_layers, output_dim)

    # Full path: Q-values materialized, argmax taken wrapper-side.
    q_out, act_out = dqn_forward(x, params)
    q_out = jax.block_until_ready(q_out)
    act_out = jax.block_until_ready(act_out)

    ref = reference_forward(x, params)
    assert q_out.shape == (B, output_dim)
    assert act_out.shape == (B,)
    assert jnp.allclose(q_out, ref, atol=1e-3, rtol=1e-3), "Q-value mismatch vs reference"
    assert jnp.array_equal(act_out, jnp.argmax(q_out, axis=-1)), "argmax mismatch"

    # Greedy-action-only path (no q writeback), must agree with the full path.
    _, act_only = dqn_forward(x, params, compute_q=False)
    act_only = jax.block_until_ready(act_only)
    assert act_only.shape == (B,)
    assert jnp.array_equal(act_only, act_out), "greedy-only path action mismatch"

    # TODO(synk): epsilon schedule, host-side random exploration, and the
    # valid-action masking of select_action are host/control-flow logic and are
    # intentionally not implemented in the kernel.
    print("KERNEL_OK")
</pallas_src>

<mosaic_0001>
module attributes {stable_mosaic.version = 11 : i64} {
  func.func @_mlp_kernel(%arg0: i32, %arg1: memref<8x128xbf16, #tpu.memory_space<vmem>>, %arg2: memref<128x128xbf16, #tpu.memory_space<vmem>>, %arg3: memref<1x128xf32, #tpu.memory_space<vmem>>, %arg4: memref<128x128xbf16, #tpu.memory_space<vmem>>, %arg5: memref<1x128xf32, #tpu.memory_space<vmem>>, %arg6: memref<128x128xbf16, #tpu.memory_space<vmem>>, %arg7: memref<1x128xf32, #tpu.memory_space<vmem>>, %arg8: memref<8x128xf32, #tpu.memory_space<vmem>>) attributes {dimension_semantics = [#tpu.dimension_semantics<parallel>], iteration_bounds = array<i64: 1>, scalar_prefetch = 0 : i64, scratch_operands = 0 : i64, tpu.core_type = #tpu.core_type<tc>, window_params = [{transform_indices = @transform_0, window_bounds = array<i64: 8, 128>}, {pipeline_mode = #tpu.pipeline_mode<synchronous>, transform_indices = @transform_1, window_bounds = array<i64: 128, 128>}, {pipeline_mode = #tpu.pipeline_mode<synchronous>, transform_indices = @transform_2, window_bounds = array<i64: 1, 128>}, {pipeline_mode = #tpu.pipeline_mode<synchronous>, transform_indices = @transform_3, window_bounds = array<i64: 128, 128>}, {pipeline_mode = #tpu.pipeline_mode<synchronous>, transform_indices = @transform_4, window_bounds = array<i64: 1, 128>}, {pipeline_mode = #tpu.pipeline_mode<synchronous>, transform_indices = @transform_5, window_bounds = array<i64: 128, 128>}, {pipeline_mode = #tpu.pipeline_mode<synchronous>, transform_indices = @transform_6, window_bounds = array<i64: 1, 128>}, {transform_indices = @transform_7, window_bounds = array<i64: 8, 128>}]} {
    %c0 = arith.constant 0 : index
    %c0_0 = arith.constant 0 : index
    %0 = vector.load %arg1[%c0, %c0_0] : memref<8x128xbf16, #tpu.memory_space<vmem>>, vector<8x128xbf16>
    %c0_1 = arith.constant 0 : index
    %c0_2 = arith.constant 0 : index
    %1 = vector.load %arg2[%c0_1, %c0_2] : memref<128x128xbf16, #tpu.memory_space<vmem>>, vector<128x128xbf16>
    %c0_3 = arith.constant 0 : index
    %c0_4 = arith.constant 0 : index
    %2 = vector.load %arg3[%c0_3, %c0_4] : memref<1x128xf32, #tpu.memory_space<vmem>>, vector<1x128xf32>
    %cst = arith.constant dense<0.000000e+00> : vector<8x128xf32>
    %3 = tpu.matmul %0, %1, %cst {dimension_numbers = #tpu.dot_dimension_numbers<[1], [0], [0], [1], [0, 0, 1, 1], [], []>} : vector<8x128xbf16>, vector<128x128xbf16>, vector<8x128xf32> -> vector<8x128xf32>
    %4 = vector.broadcast %2 : vector<1x128xf32> to vector<8x128xf32>
    %5 = arith.addf %3, %4 : vector<8x128xf32>
    %cst_5 = arith.constant 0.000000e+00 : f32
    %6 = vector.broadcast %cst_5 : f32 to vector<8x128xf32>
    %7 = arith.cmpf oge, %5, %6 : vector<8x128xf32>
    %cst_6 = arith.constant 0.00999999977 : f32
    %8 = vector.broadcast %cst_6 : f32 to vector<8x128xf32>
    %9 = arith.mulf %8, %5 : vector<8x128xf32>
    %10 = arith.select %7, %5, %9 : vector<8x128xi1>, vector<8x128xf32>
    %11 = arith.truncf %10 : vector<8x128xf32> to vector<8x128xbf16>
    %c0_7 = arith.constant 0 : index
    %c0_8 = arith.constant 0 : index
    %12 = vector.load %arg4[%c0_7, %c0_8] : memref<128x128xbf16, #tpu.memory_space<vmem>>, vector<128x128xbf16>
    %c0_9 = arith.constant 0 : index
    %c0_10 = arith.constant 0 : index
    %13 = vector.load %arg5[%c0_9, %c0_10] : memref<1x128xf32, #tpu.memory_space<vmem>>, vector<1x128xf32>
    %cst_11 = arith.constant dense<0.000000e+00> : vector<8x128xf32>
    %14 = tpu.matmul %11, %12, %cst_11 {dimension_numbers = #tpu.dot_dimension_numbers<[1], [0], [0], [1], [0, 0, 1, 1], [], []>} : vector<8x128xbf16>, vector<128x128xbf16>, vector<8x128xf32> -> vector<8x128xf32>
    %15 = vector.broadcast %13 : vector<1x128xf32> to vector<8x128xf32>
    %16 = arith.addf %14, %15 : vector<8x128xf32>
    %cst_12 = arith.constant 0.000000e+00 : f32
    %17 = vector.broadcast %cst_12 : f32 to vector<8x128xf32>
    %18 = arith.cmpf oge, %16, %17 : vector<8x128xf32>
    %cst_13 = arith.constant 0.00999999977 : f32
    %19 = vector.broadcast %cst_13 : f32 to vector<8x128xf32>
    %20 = arith.mulf %19, %16 : vector<8x128xf32>
    %21 = arith.select %18, %16, %20 : vector<8x128xi1>, vector<8x128xf32>
    %22 = arith.truncf %21 : vector<8x128xf32> to vector<8x128xbf16>
    %c0_14 = arith.constant 0 : index
    %c0_15 = arith.constant 0 : index
    %23 = vector.load %arg6[%c0_14, %c0_15] : memref<128x128xbf16, #tpu.memory_space<vmem>>, vector<128x128xbf16>
    %c0_16 = arith.constant 0 : index
    %c0_17 = arith.constant 0 : index
    %24 = vector.load %arg7[%c0_16, %c0_17] : memref<1x128xf32, #tpu.memory_space<vmem>>, vector<1x128xf32>
    %cst_18 = arith.constant dense<0.000000e+00> : vector<8x128xf32>
    %25 = tpu.matmul %22, %23, %cst_18 {dimension_numbers = #tpu.dot_dimension_numbers<[1], [0], [0], [1], [0, 0, 1, 1], [], []>} : vector<8x128xbf16>, vector<128x128xbf16>, vector<8x128xf32> -> vector<8x128xf32>
    %26 = vector.broadcast %24 : vector<1x128xf32> to vector<8x128xf32>
    %27 = arith.addf %25, %26 : vector<8x128xf32>
    %c0_19 = arith.constant 0 : index
    %c0_20 = arith.constant 0 : index
    %28 = vector.load %arg8[%c0_19, %c0_20] : memref<8x128xf32, #tpu.memory_space<vmem>>, vector<8x128xf32>
    tpu.vector_store %arg8[%c0_19, %c0_20], %27 {strides = array<i32>} : memref<8x128xf32, #tpu.memory_space<vmem>>, vector<8x128xf32>,
    return
  }
  func.func @transform_0(%arg0: i32) -> (i32, i32) {
    %c0_i32 = arith.constant 0 : i32
    %c0_i32_0 = arith.constant 0 : i32
    return %arg0, %c0_i32 : i32, i32
  }
  func.func @transform_1(%arg0: i32) -> (i32, i32) {
    %c0_i32 = arith.constant 0 : i32
    %c0_i32_0 = arith.constant 0 : i32
    %c0_i32_1 = arith.constant 0 : i32
    return %c0_i32, %c0_i32_0 : i32, i32
  }
  func.func @transform_2(%arg0: i32) -> (i32, i32) {
    %c0_i32 = arith.constant 0 : i32
    %c0_i32_0 = arith.constant 0 : i32
    %c0_i32_1 = arith.constant 0 : i32
    return %c0_i32, %c0_i32_0 : i32, i32
  }
  func.func @transform_3(%arg0: i32) -> (i32, i32) {
    %c0_i32 = arith.constant 0 : i32
    %c0_i32_0 = arith.constant 0 : i32
    %c0_i32_1 = arith.constant 0 : i32
    return %c0_i32, %c0_i32_0 : i32, i32
  }
  func.func @transform_4(%arg0: i32) -> (i32, i32) {
    %c0_i32 = arith.constant 0 : i32
    %c0_i32_0 = arith.constant 0 : i32
    %c0_i32_1 = arith.constant 0 : i32
    return %c0_i32, %c0_i32_0 : i32, i32
  }
  func.func @transform_5(%arg0: i32) -> (i32, i32) {
    %c0_i32 = arith.constant 0 : i32
    %c0_i32_0 = arith.constant 0 : i32
    %c0_i32_1 = arith.constant 0 : i32
    return %c0_i32, %c0_i32_0 : i32, i32
  }
  func.func @transform_6(%arg0: i32) -> (i32, i32) {
    %c0_i32 = arith.constant 0 : i32
    %c0_i32_0 = arith.constant 0 : i32
    %c0_i32_1 = arith.constant 0 : i32
    return %c0_i32, %c0_i32_0 : i32, i32
  }
  func.func @transform_7(%arg0: i32) -> (i32, i32) {
    %c0_i32 = arith.constant 0 : i32
    %c0_i32_0 = arith.constant 0 : i32
    return %arg0, %c0_i32 : i32, i32
  }
}

module attributes {stable_mosaic.version = 11 : i64} {
  func.func @_mlp_kernel(%arg0: i32, %arg1: memref<8x128xbf16, #tpu.memory_space<vmem>>, %arg2: memref<128x128xbf16, #tpu.memory_space<vmem>>, %arg3: memref<1x128xf32, #tpu.memory_space<vmem>>, %arg4: memref<128x128xbf16, #tpu.memory_space<vmem>>, %arg5: memref<1x128xf32, #tpu.memory_space<vmem>>, %arg6: memref<128x128xbf16, #tpu.memory_space<vmem>>, %arg7: memref<1x128xf32, #tpu.memory_space<vmem>>, %arg8: memref<8x128xf32, #tpu.memory_space<vmem>>) attributes {dimension_semantics = [#tpu.dimension_semantics<parallel>], iteration_bounds = array<i64: 1>, scalar_prefetch = 0 : i64, scratch_operands = 0 : i64, tpu.core_type = #tpu.core_type<tc>, window_params = [{transform_indices = @transform_0, window_bounds = array<i64: 8, 128>}, {pipeline_mode = #tpu.pipeline_mode<synchronous>, transform_indices = @transform_1, window_bounds = array<i64: 128, 128>}, {pipeline_mode = #tpu.pipeline_mode<synchronous>, transform_indices = @transform_2, window_bounds = array<i64: 1, 128>}, {pipeline_mode = #tpu.pipeline_mode<synchronous>, transform_indices = @transform_3, window_bounds = array<i64: 128, 128>}, {pipeline_mode = #tpu.pipeline_mode<synchronous>, transform_indices = @transform_4, window_bounds = array<i64: 1, 128>}, {pipeline_mode = #tpu.pipeline_mode<synchronous>, transform_indices = @transform_5, window_bounds = array<i64: 128, 128>}, {pipeline_mode = #tpu.pipeline_mode<synchronous>, transform_indices = @transform_6, window_bounds = array<i64: 1, 128>}, {transform_indices = @transform_7, window_bounds = array<i64: 8, 128>}]} {
    %c0 = arith.constant 0 : index
    %c0_0 = arith.constant 0 : index
    %0 = vector.load %arg1[%c0, %c0_0] : memref<8x128xbf16, #tpu.memory_space<vmem>>, vector<8x128xbf16>
    %c0_1 = arith.constant 0 : index
    %c0_2 = arith.constant 0 : index
    %1 = vector.load %arg2[%c0_1, %c0_2] : memref<128x128xbf16, #tpu.memory_space<vmem>>, vector<128x128xbf16>
    %c0_3 = arith.constant 0 : index
    %c0_4 = arith.constant 0 : index
    %2 = vector.load %arg3[%c0_3, %c0_4] : memref<1x128xf32, #tpu.memory_space<vmem>>, vector<1x128xf32>
    %cst = arith.constant dense<0.000000e+00> : vector<8x128xf32>
    %3 = tpu.matmul %0, %1, %cst {dimension_numbers = #tpu.dot_dimension_numbers<[1], [0], [0], [1], [0, 0, 1, 1], [], []>} : vector<8x128xbf16>, vector<128x128xbf16>, vector<8x128xf32> -> vector<8x128xf32>
    %4 = vector.broadcast %2 : vector<1x128xf32> to vector<8x128xf32>
    %5 = arith.addf %3, %4 : vector<8x128xf32>
    %cst_5 = arith.constant 0.000000e+00 : f32
    %6 = vector.broadcast %cst_5 : f32 to vector<8x128xf32>
    %7 = arith.cmpf oge, %5, %6 : vector<8x128xf32>
    %cst_6 = arith.constant 0.00999999977 : f32
    %8 = vector.broadcast %cst_6 : f32 to vector<8x128xf32>
    %9 = arith.mulf %8, %5 : vector<8x128xf32>
    %10 = arith.select %7, %5, %9 : vector<8x128xi1>, vector<8x128xf32>
    %11 = arith.truncf %10 : vector<8x128xf32> to vector<8x128xbf16>
    %c0_7 = arith.constant 0 : index
    %c0_8 = arith.constant 0 : index
    %12 = vector.load %arg4[%c0_7, %c0_8] : memref<128x128xbf16, #tpu.memory_space<vmem>>, vector<128x128xbf16>
    %c0_9 = arith.constant 0 : index
    %c0_10 = arith.constant 0 : index
    %13 = vector.load %arg5[%c0_9, %c0_10] : memref<1x128xf32, #tpu.memory_space<vmem>>, vector<1x128xf32>
    %cst_11 = arith.constant dense<0.000000e+00> : vector<8x128xf32>
    %14 = tpu.matmul %11, %12, %cst_11 {dimension_numbers = #tpu.dot_dimension_numbers<[1], [0], [0], [1], [0, 0, 1, 1], [], []>} : vector<8x128xbf16>, vector<128x128xbf16>, vector<8x128xf32> -> vector<8x128xf32>
    %15 = vector.broadcast %13 : vector<1x128xf32> to vector<8x128xf32>
    %16 = arith.addf %14, %15 : vector<8x128xf32>
    %cst_12 = arith.constant 0.000000e+00 : f32
    %17 = vector.broadcast %cst_12 : f32 to vector<8x128xf32>
    %18 = arith.cmpf oge, %16, %17 : vector<8x128xf32>
    %cst_13 = arith.constant 0.00999999977 : f32
    %19 = vector.broadcast %cst_13 : f32 to vector<8x128xf32>
    %20 = arith.mulf %19, %16 : vector<8x128xf32>
    %21 = arith.select %18, %16, %20 : vector<8x128xi1>, vector<8x128xf32>
    %22 = arith.truncf %21 : vector<8x128xf32> to vector<8x128xbf16>
    %c0_14 = arith.constant 0 : index
    %c0_15 = arith.constant 0 : index
    %23 = vector.load %arg6[%c0_14, %c0_15] : memref<128x128xbf16, #tpu.memory_space<vmem>>, vector<128x128xbf16>
    %c0_16 = arith.constant 0 : index
    %c0_17 = arith.constant 0 : index
    %24 = vector.load %arg7[%c0_16, %c0_17] : memref<1x128xf32, #tpu.memory_space<vmem>>, vector<1x128xf32>
    %cst_18 = arith.constant dense<0.000000e+00> : vector<8x128xf32>
    %25 = tpu.matmul %22, %23, %cst_18 {dimension_numbers = #tpu.dot_dimension_numbers<[1], [0], [0], [1], [0, 0, 1, 1], [], []>} : vector<8x128xbf16>, vector<128x128xbf16>, vector<8x128xf32> -> vector<8x128xf32>
    %26 = vector.broadcast %24 : vector<1x128xf32> to vector<8x128xf32>
    %27 = arith.addf %25, %26 : vector<8x128xf32>
    %c0_19 = arith.constant 0 : index
    %c0_20 = arith.constant 0 : index
    %28 = vector.load %arg8[%c0_19, %c0_20] : memref<8x128xf32, #tpu.memory_space<vmem>>, vector<8x128xf32>
    tpu.vector_store %arg8[%c0_19, %c0_20], %27 {strides = array<i32>} : memref<8x128xf32, #tpu.memory_space<vmem>>, vector<8x128xf32>,
    return
  }
  func.func @transform_0(%arg0: i32) -> (i32, i32) {
    %c0_i32 = arith.constant 0 : i32
    %c0_i32_0 = arith.constant 0 : i32
    return %arg0, %c0_i32 : i32, i32
  }
  func.func @transform_1(%arg0: i32) -> (i32, i32) {
    %c0_i32 = arith.constant 0 : i32
    %c0_i32_0 = arith.constant 0 : i32
    %c0_i32_1 = arith.constant 0 : i32
    return %c0_i32, %c0_i32_0 : i32, i32
  }
  func.func @transform_2(%arg0: i32) -> (i32, i32) {
    %c0_i32 = arith.constant 0 : i32
    %c0_i32_0 = arith.constant 0 : i32
    %c0_i32_1 = arith.constant 0 : i32
    return %c0_i32, %c0_i32_0 : i32, i32
  }
  func.func @transform_3(%arg0: i32) -> (i32, i32) {
    %c0_i32 = arith.constant 0 : i32
    %c0_i32_0 = arith.constant 0 : i32
    %c0_i32_1 = arith.constant 0 : i32
    return %c0_i32, %c0_i32_0 : i32, i32
  }
  func.func @transform_4(%arg0: i32) -> (i32, i32) {
    %c0_i32 = arith.constant 0 : i32
    %c0_i32_0 = arith.constant 0 : i32
    %c0_i32_1 = arith.constant 0 : i32
    return %c0_i32, %c0_i32_0 : i32, i32
  }
  func.func @transform_5(%arg0: i32) -> (i32, i32) {
    %c0_i32 = arith.constant 0 : i32
    %c0_i32_0 = arith.constant 0 : i32
    %c0_i32_1 = arith.constant 0 : i32
    return %c0_i32, %c0_i32_0 : i32, i32
  }
  func.func @transform_6(%arg0: i32) -> (i32, i32) {
    %c0_i32 = arith.constant 0 : i32
    %c0_i32_0 = arith.constant 0 : i32
    %c0_i32_1 = arith.constant 0 : i32
    return %c0_i32, %c0_i32_0 : i32, i32
  }
  func.func @transform_7(%arg0: i32) -> (i32, i32) {
    %c0_i32 = arith.constant 0 : i32
    %c0_i32_0 = arith.constant 0 : i32
    return %arg0, %c0_i32 : i32, i32
  }
}

</mosaic_0001>

<bundles_post_ra>
// kernel: tpu_custom_call.1
= control target key start
LH: loop header
LB: loop body
LE: loop exit
PB: predicated region body
PF: predicated region fallthrough
CT: control target
= control target key end

     0   :  { %12 = vsyncpa [#allocation3], 0  ;;  %s863_s0 = inlined_call_operand.hbm [shape: bf16[8,128], index: 0, kind: input, shape index: {}]   ;;  %s864_s1 = inlined_call_operand.hbm [shape: bf16[128,128], index: 1, kind: input, shape index: {}]   ;;  %s865_s2 = inlined_call_operand.vmem [shape: f32[1,128], index: 2, kind: input, shape index: {}]   ;;  %s866_s3 = inlined_call_operand.hbm [shape: bf16[128,128], index: 3, kind: input, shape index: {}]   ;;  %s867_s4 = inlined_call_operand.vmem [shape: f32[1,128], index: 4, kind: input, shape index: {}]   ;;  %s868_s5 = inlined_call_operand.hbm [shape: bf16[128,128], index: 5, kind: input, shape index: {}]   ;;  %s869_s6 = inlined_call_operand.vmem [shape: f32[1,128], index: 6, kind: input, shape index: {}]   ;;  %s870_s7 = inlined_call_operand.hbm [shape: f32[8,128], index: 7, kind: output, shape index: {}]  }
   0x1   :  { %13 = vsyncpa [#allocation6], 0 }
   0x2   :  { %14 = vsyncpa [#allocation9], 0 }
   0x3   :  { %15 = vsyncpa [#allocation4], 0  ;;  %s706_s24 = smov [#allocation5]   ;;  %s588_s28 = scalar_lea.hbm %s864_s1, 1024 }
   0x4   :  { %s31_s25 = sshll.u32 %s706_s24, 4  ;;  %p589_p0 = scmp.ne.s32.totalorder %s864_s1, %s588_s28  ;;  %s32_s25 = int_to_ptr.vmem [resolvable:$true] %s31_s25 }
   0x5   :  { %p592_p1 = scmp.lt.u32.totalorder %s588_s28, %s864_s1 }
   0x7   :  { %p594_p2 = pnand %p592_p1, %p589_p0 }
   0x9   :  { %597 = shalt.err (!%p594_p2)
}
   0xa   :  { %s598_s10 = scalar_lea.vmem %s32_s25, 1024  ;;  %p603_p4 = scmp.lt.s32.totalorder %s32_s25, %s32_s25 }
   0xb   :  { %p599_p3 = scmp.ne.s32.totalorder %s32_s25, %s598_s10  ;;  %p604_p5 = scmp.lt.s32.totalorder %s598_s10, %s598_s10 }
   0xd   :  { %p605_p6 = por %p604_p5, %p603_p4 }
   0xf   :  { %p606_p7 = pnand %p605_p6, %p599_p3 }
  0x11   :  { %609 = shalt.err (!%p606_p7)
}
  0x12   :  { %s707_s11 = smov 64   ;;  %s708_s12 = smov 4  }
  0x13   :  { %37 = dma.hbm_to_vmem [thread:$0]  %s864_s1, 1024, %s32_s25, [#allocation6], %s707_s11, %s707_s11, %s708_s12  }
  0x14   :  { %s709_s15 = smov [#allocation2]   ;;  %s710_s17 = smov [#allocation7]  }
  0x15   :  { %s22_s16 = sshll.u32 %s709_s15, 4  ;;  %s45_s18 = sshll.u32 %s710_s17, 4  ;;  %s23_s16 = int_to_ptr.vmem [resolvable:$true] %s22_s16  ;;  %s46_s18 = int_to_ptr.vmem [resolvable:$true] %s45_s18 }
  0x16   :  { %s610_s21 = scalar_lea.hbm %s863_s0, 64 }
  0x17   :  { %p611_p8 = scmp.ne.s32.totalorder %s863_s0, %s610_s21  ;;  %p614_p9 = scmp.lt.u32.totalorder %s610_s21, %s863_s0 }
  0x19   :  { %p616_p10 = pnand %p614_p9, %p611_p8 }
  0x1b   :  { %619 = shalt.err (!%p616_p10)
}
  0x1c   :  { %s620_s1 = scalar_lea.vmem %s23_s16, 64  ;;  %p625_p12 = scmp.lt.s32.totalorder %s23_s16, %s23_s16 }
  0x1d   :  { %p621_p11 = scmp.ne.s32.totalorder %s23_s16, %s620_s1  ;;  %p626_p13 = scmp.lt.s32.totalorder %s620_s1, %s620_s1 }
  0x1f   :  { %p627_p0 = por %p626_p13, %p625_p12 }
  0x21   :  { %p628_p1 = pnand %p627_p0, %p621_p11 }
  0x23   :  { %631 = shalt.err (!%p628_p1)
}
  0x24   :  { %25 = dma.hbm_to_vmem [thread:$0]  %s863_s0, 64, %s23_s16, [#allocation3]  }
  0x25   :  { %s632_s30 = scalar_lea.hbm %s866_s3, 1024 }
  0x26   :  { %p633_p2 = scmp.ne.s32.totalorder %s866_s3, %s632_s30  ;;  %p636_p3 = scmp.lt.u32.totalorder %s632_s30, %s866_s3 }
  0x28   :  { %p638_p4 = pnand %p636_p3, %p633_p2 }
  0x2a   :  { %641 = shalt.err (!%p638_p4)
}
  0x2b   :  { %s642_s14 = scalar_lea.vmem %s46_s18, 1024  ;;  %p647_p6 = scmp.lt.s32.totalorder %s46_s18, %s46_s18 }
  0x2c   :  { %p643_p5 = scmp.ne.s32.totalorder %s46_s18, %s642_s14  ;;  %p648_p7 = scmp.lt.s32.totalorder %s642_s14, %s642_s14 }
  0x2e   :  { %p649_p8 = por %p648_p7, %p647_p6 }
  0x30   :  { %p650_p9 = pnand %p649_p8, %p643_p5 }
  0x32   :  { %653 = shalt.err (!%p650_p9)
}
  0x33   :  { %51 = dma.hbm_to_vmem [thread:$0]  %s866_s3, 1024, %s46_s18, [#allocation6], %s707_s11, %s707_s11, %s708_s12  }
  0x34   :  { %s711_s16 = smov [#allocation8]   ;;  %s654_s21 = scalar_lea.hbm %s868_s5, 1024 }
  0x35   :  { %s59_s17 = sshll.u32 %s711_s16, 4  ;;  %p655_p10 = scmp.ne.s32.totalorder %s868_s5, %s654_s21  ;;  %s60_s17 = int_to_ptr.vmem [resolvable:$true] %s59_s17 }
  0x36   :  { %p658_p11 = scmp.lt.u32.totalorder %s654_s21, %s868_s5 }
  0x38   :  { %p660_p12 = pnand %p658_p11, %p655_p10 }
  0x3a   :  { %663 = shalt.err (!%p660_p12)
}
  0x3b   :  { %s664_s1 = scalar_lea.vmem %s60_s17, 1024  ;;  %p669_p0 = scmp.lt.s32.totalorder %s60_s17, %s60_s17 }
  0x3c   :  { %p665_p13 = scmp.ne.s32.totalorder %s60_s17, %s664_s1  ;;  %p670_p1 = scmp.lt.s32.totalorder %s664_s1, %s664_s1 }
  0x3e   :  { %p671_p2 = por %p670_p1, %p669_p0 }
  0x40   :  { %p672_p3 = pnand %p671_p2, %p665_p13 }
  0x42   :  { %675 = shalt.err (!%p672_p3)
}
  0x43   :  { %65 = dma.hbm_to_vmem [thread:$0]  %s868_s5, 1024, %s60_s17, [#allocation9], %s707_s11, %s707_s11, %s708_s12  }
  0x44   :  { %698 = dma.done.wait [#allocation3], 64  }
  0x45   :  { %699 = vsyncadd [#allocation3], 4294967232 }
  0x46   :  { %700 = dma.done.wait [#allocation6], 2048  }
  0x47   :  { %701 = vsyncadd [#allocation6], 4294965248 }
  0x48   :  { %702 = dma.done.wait [#allocation9], 1024  }
  0x49   :  { %703 = vsyncadd [#allocation9], 4294966272  ;;  %v712_v0 = vmov 0.0   ;;  %vm713_vm0 = vmmov 0   ;;  %v564_v1 = vld [vmem:[#allocation5] sm:$0xff]   ;;  %v565_v2 = vld [vmem:[#allocation5 + $0x8] sm:$0xff]  }
  0x4a   :  { %495 = vmatprep.subr.bf16.mxu0 %v712_v0  ;;  %511 = vmatprep.mubr.msk.bf16.mxu0 %vm713_vm0, %v712_v0  ;;  %v566_v3 = vld [vmem:[#allocation5 + $0x10] sm:$0xff]   ;;  %v572_v4 = vld [vmem:[#allocation7] sm:$0xff]   ;;  %v567_v5 = vld [vmem:[#allocation5 + $0x18] sm:$0xff]   ;;  %s714_s28 = smov [#allocation10]  }
  0x4b   :  { %515 = vmatprep.subr.bf16.mxu1 %v712_v0  ;;  %531 = vmatprep.mubr.msk.bf16.mxu1 %vm713_vm0, %v712_v0  ;;  %v573_v6 = vld [vmem:[#allocation7 + $0x8] sm:$0xff]   ;;  %v568_v7 = vld [vmem:[#allocation5 + $0x20] sm:$0xff]   ;;  %v574_v8 = vld [vmem:[#allocation7 + $0x10] sm:$0xff]   ;;  %s430_s29 = sshll.u32 %s714_s28, 4  ;;  %s431_s29 = int_to_ptr.vmem [resolvable:$true] %s430_s29 }
  0x4c   :  { %496 = vmatpush3.bf16.msra.mxu0 %v564_v1  ;;  %516 = vmatpush3.bf16.msra.mxu1 %v572_v4  ;;  %v569_v9 = vld [vmem:[#allocation5 + $0x28] sm:$0xff]   ;;  %v575_v10 = vld [vmem:[#allocation7 + $0x18] sm:$0xff]   ;;  %v570_v11 = vld [vmem:[#allocation5 + $0x30] sm:$0xff]   ;;  %p681_p5 = scmp.lt.s32.totalorder %s431_s29, %s431_s29 }
  0x4d   :  { %497 = vmatprep.subr.bf16.mxu0 %v712_v0  ;;  %517 = vmatprep.subr.bf16.mxu1 %v712_v0  ;;  %v576_v12 = vld [vmem:[#allocation7 + $0x20] sm:$0xff]   ;;  %v571_v13 = vld [vmem:[#allocation5 + $0x38] sm:$0xff]   ;;  %v577_v14 = vld [vmem:[#allocation7 + $0x28] sm:$0xff]  }
  0x4e   :  { %v81_v15 = vld [vmem:[#allocation2] sm:$0xf]  ;;  %v578_v16 = vld [vmem:[#allocation7 + $0x30] sm:$0xff]   ;;  %v580_v18 = vld [vmem:[#allocation8] sm:$0xff]  }
  0x4f   :  { %v579_v17 = vld [vmem:[#allocation7 + $0x38] sm:$0xff]   ;;  %v581_v19 = vld [vmem:[#allocation8 + $0x8] sm:$0xff]   ;;  %v582_v20 = vld [vmem:[#allocation8 + $0x10] sm:$0xff]  }
  0x50   :  { %498 = vmatpush3.bf16.msra.mxu0 %v565_v2  ;;  %518 = vmatpush3.bf16.msra.mxu1 %v573_v6  ;;  %v583_v21 = vld [vmem:[#allocation8 + $0x18] sm:$0xff]   ;;  %v584_v22 = vld [vmem:[#allocation8 + $0x20] sm:$0xff]   ;;  %v585_v23 = vld [vmem:[#allocation8 + $0x28] sm:$0xff]  }
  0x51   :  { %499 = vmatprep.subr.bf16.mxu0 %v712_v0  ;;  %519 = vmatprep.subr.bf16.mxu1 %v712_v0  ;;  %v441_v24 = vld [vmem:[%s865_s2] ss:$0 sm:$0xff]  ;;  %v586_v33 = vld [vmem:[#allocation8 + $0x30] sm:$0xff]  }
  0x52   :  { %v587_v34 = vld [vmem:[#allocation8 + $0x38] sm:$0xff]  }
  0x53   :  { %v450_v35 = vld [vmem:[%s867_s4] ss:$0 sm:$0xff]  ;;  %s676_s4 = scalar_lea.vmem %s431_s29, 128 }
  0x54   :  { %500 = vmatpush3.bf16.msra.mxu0 %v566_v3  ;;  %520 = vmatpush3.bf16.msra.mxu1 %v574_v8  ;;  %v459_v44 = vld [vmem:[%s869_s6] ss:$0 sm:$0xff]  ;;  %p677_p4 = scmp.ne.s32.totalorder %s431_s29, %s676_s4  ;;  %p682_p6 = scmp.lt.s32.totalorder %s676_s4, %s676_s4 }
  0x55   :  { %501 = vmatprep.subr.bf16.mxu0 %v712_v0  ;;  %521 = vmatprep.subr.bf16.mxu1 %v712_v0 }
  0x56   :  { %p683_p7 = por %p682_p6, %p681_p5 }
  0x58   :  { %502 = vmatpush3.bf16.msra.mxu0 %v567_v5  ;;  %522 = vmatpush3.bf16.msra.mxu1 %v575_v10  ;;  %p684_p8 = pnand %p683_p7, %p677_p4 }
  0x59   :  { %503 = vmatprep.subr.bf16.mxu0 %v712_v0  ;;  %523 = vmatprep.subr.bf16.mxu1 %v712_v0 }
  0x5c   :  { %504 = vmatpush3.bf16.msra.mxu0 %v568_v7  ;;  %524 = vmatpush3.bf16.msra.mxu1 %v576_v12 }
  0x5d   :  { %505 = vmatprep.subr.bf16.mxu0 %v712_v0  ;;  %525 = vmatprep.subr.bf16.mxu1 %v712_v0 }
  0x60   :  { %506 = vmatpush3.bf16.msra.mxu0 %v569_v9  ;;  %526 = vmatpush3.bf16.msra.mxu1 %v577_v14 }
  0x61   :  { %507 = vmatprep.subr.bf16.mxu0 %v712_v0  ;;  %527 = vmatprep.subr.bf16.mxu1 %v712_v0 }
  0x64   :  { %508 = vmatpush3.bf16.msra.mxu0 %v570_v11  ;;  %528 = vmatpush3.bf16.msra.mxu1 %v578_v16 }
  0x65   :  { %509 = vmatprep.subr.bf16.mxu0 %v712_v0  ;;  %529 = vmatprep.subr.bf16.mxu1 %v712_v0 }
  0x68   :  { %510 = vmatpush3.bf16.msra.mxu0 %v571_v13  ;;  %530 = vmatpush3.bf16.msra.mxu1 %v579_v17 }
  0x69   :  { %535 = vmatprep.subr.bf16.mxu0 %v712_v0 }
  0x6b   :  { %512 = vmatmul.mubr.bf16.vlgmr.msra.gmra.mrb[0].mxu0 %v81_v15 }
  0x6c   :  { %551 = vmatprep.mubr.msk.bf16.mxu0 %vm713_vm0, %v712_v0  ;;  %536 = vmatpush3.bf16.msra.mxu0 %v580_v18 }
  0x6d   :  { %537 = vmatprep.subr.bf16.mxu0 %v712_v0 }
  0x70   :  { %538 = vmatpush3.bf16.msra.mxu0 %v581_v19 }
  0x71   :  { %539 = vmatprep.subr.bf16.mxu0 %v712_v0 }
  0x74   :  { %540 = vmatpush3.bf16.msra.mxu0 %v582_v20 }
  0x75   :  { %541 = vmatprep.subr.bf16.mxu0 %v712_v0 }
  0x78   :  { %542 = vmatpush3.bf16.msra.mxu0 %v583_v21 }
  0x79   :  { %543 = vmatprep.subr.bf16.mxu0 %v712_v0 }
  0x7c   :  { %544 = vmatpush3.bf16.msra.mxu0 %v584_v22 }
  0x7d   :  { %545 = vmatprep.subr.bf16.mxu0 %v712_v0 }
  0x80   :  { %546 = vmatpush3.bf16.msra.mxu0 %v585_v23 }
  0x81   :  { %547 = vmatprep.subr.bf16.mxu0 %v712_v0 }
  0x84   :  { %548 = vmatpush3.bf16.msra.mxu0 %v586_v33 }
  0x85   :  { %549 = vmatprep.subr.bf16.mxu0 %v712_v0 }
  0x88   :  { %550 = vmatpush3.bf16.msra.mxu0 %v587_v34 }
 0x13e   :  { %v187_v25 = vpop.f32.mrb[0].mxu0 }
 0x13f   :  { %v188_v26 = vadd.f32 %v441_v24, %v187_v25  ;;  %v513_v27 = vpop.f32.mrb[1].mxu0 }
 0x140   :  { %v190_v28 = vpop.f32.mrb[2].mxu0 }
 0x141   :  { %vm193_vm1 = vcmp.ge.f32.partialorder %v188_v26, 0.0  ;;  %v194_v29 = vmul.f32 0.01, %v188_v26  ;;  %v514_v30 = vpop.f32.mrb[3].mxu0 }
 0x143   :  { %v195_v31 = vsel %vm193_vm1, %v188_v26, %v194_v29 }
 0x144   :  { %v196_v32 = vpack.c.bf16 %v195_v31, %v195_v31 }
 0x146   :  { %532 = vmatmul.mubr.bf16.vlgmr.msra.gmra.mrb[0].mxu1 %v196_v32 }
 0x219   :  { %v302_v36 = vpop.f32.mrb[0].mxu1 }
 0x21a   :  { %v303_v37 = vadd.f32 %v450_v35, %v302_v36  ;;  %v533_v38 = vpop.f32.mrb[1].mxu1 }
 0x21b   :  { %v305_v39 = vpop.f32.mrb[2].mxu1 }
 0x21c   :  { %vm308_vm2 = vcmp.ge.f32.partialorder %v303_v37, 0.0  ;;  %v309_v40 = vmul.f32 0.01, %v303_v37  ;;  %v534_v41 = vpop.f32.mrb[3].mxu1 }
 0x21e   :  { %v310_v42 = vsel %vm308_vm2, %v303_v37, %v309_v40 }
 0x21f   :  { %v311_v43 = vpack.c.bf16 %v310_v42, %v310_v42 }
 0x221   :  { %552 = vmatmul.mubr.bf16.vlgmr.msra.gmra.mrb[4].mxu0 %v311_v43 }
 0x2f4   :  { %v417_v45 = vpop.f32.mrb[4].mxu0 }
 0x2f5   :  { %v418_v46 = vadd.f32 %v459_v44, %v417_v45  ;;  %v553_v47 = vpop.f32.mrb[5].mxu0 }
 0x2f6   :  { %v420_v48 = vpop.f32.mrb[6].mxu0 }
 0x2f7   :  { %423 = vst [vmem:[#allocation10] sm:$0xff] %v418_v46  ;;  %v554_v49 = vpop.f32.mrb[7].mxu0 }
 0x2f8   :  { %687 = shalt.err (!%p684_p8)
}
 0x2f9   :  { %s688_s6 = scalar_lea.hbm %s870_s7, 128 }
 0x2fa   :  { %p689_p9 = scmp.ne.s32.totalorder %s870_s7, %s688_s6  ;;  %p692_p10 = scmp.lt.u32.totalorder %s688_s6, %s870_s7 }
 0x2fc   :  { %p694_p11 = pnand %p692_p10, %p689_p9 }
 0x2fe   :  { %697 = shalt.err (!%p694_p11)
}
 0x2ff   :  { %433 = dma.vmem_to_hbm [thread:$0]  %s431_s29, 128, %s870_s7, [#allocation4]  }
 0x300   :  { %704 = dma.done.wait [#allocation4], 128  }
 0x301   :  { %705 = vsyncadd [#allocation4], 4294967168 }
 0x302   :  { %437 = vsyncpa [#allocation3], 1 }
 0x303   :  { %438 = vsyncpa [#allocation6], 1 }
 0x304   :  { %439 = vsyncpa [#allocation9], 1 }
 0x305   :  { %440 = vsyncpa [#allocation4], 1 }

// kernel: tpu_custom_call.1
= control target key start
LH: loop header
LB: loop body
LE: loop exit
PB: predicated region body
PF: predicated region fallthrough
CT: control target
= control target key end

     0   :  { %12 = vsyncpa [#allocation3], 0  ;;  %s863_s0 = inlined_call_operand.hbm [shape: bf16[8,128], index: 0, kind: input, shape index: {}]   ;;  %s864_s1 = inlined_call_operand.hbm [shape: bf16[128,128], index: 1, kind: input, shape index: {}]   ;;  %s865_s2 = inlined_call_operand.vmem [shape: f32[1,128], index: 2, kind: input, shape index: {}]   ;;  %s866_s3 = inlined_call_operand.hbm [shape: bf16[128,128], index: 3, kind: input, shape index: {}]   ;;  %s867_s4 = inlined_call_operand.vmem [shape: f32[1,128], index: 4, kind: input, shape index: {}]   ;;  %s868_s5 = inlined_call_operand.hbm [shape: bf16[128,128], index: 5, kind: input, shape index: {}]   ;;  %s869_s6 = inlined_call_operand.vmem [shape: f32[1,128], index: 6, kind: input, shape index: {}]   ;;  %s870_s7 = inlined_call_operand.hbm [shape: f32[8,128], index: 7, kind: output, shape index: {}]  }
   0x1   :  { %13 = vsyncpa [#allocation6], 0 }
   0x2   :  { %14 = vsyncpa [#allocation9], 0 }
   0x3   :  { %15 = vsyncpa [#allocation4], 0  ;;  %s706_s24 = smov [#allocation5]   ;;  %s588_s28 = scalar_lea.hbm %s864_s1, 1024 }
   0x4   :  { %s31_s25 = sshll.u32 %s706_s24, 4  ;;  %p589_p0 = scmp.ne.s32.totalorder %s864_s1, %s588_s28  ;;  %s32_s25 = int_to_ptr.vmem [resolvable:$true] %s31_s25 }
   0x5   :  { %p592_p1 = scmp.lt.u32.totalorder %s588_s28, %s864_s1 }
   0x7   :  { %p594_p2 = pnand %p592_p1, %p589_p0 }
   0x9   :  { %597 = shalt.err (!%p594_p2)
}
   0xa   :  { %s598_s10 = scalar_lea.vmem %s32_s25, 1024  ;;  %p603_p4 = scmp.lt.s32.totalorder %s32_s25, %s32_s25 }
   0xb   :  { %p599_p3 = scmp.ne.s32.totalorder %s32_s25, %s598_s10  ;;  %p604_p5 = scmp.lt.s32.totalorder %s598_s10, %s598_s10 }
   0xd   :  { %p605_p6 = por %p604_p5, %p603_p4 }
   0xf   :  { %p606_p7 = pnand %p605_p6, %p599_p3 }
  0x11   :  { %609 = shalt.err (!%p606_p7)
}
  0x12   :  { %s707_s11 = smov 64   ;;  %s708_s12 = smov 4  }
  0x13   :  { %37 = dma.hbm_to_vmem [thread:$0]  %s864_s1, 1024, %s32_s25, [#allocation6], %s707_s11, %s707_s11, %s708_s12  }
  0x14   :  { %s709_s15 = smov [#allocation2]   ;;  %s710_s17 = smov [#allocation7]  }
  0x15   :  { %s22_s16 = sshll.u32 %s709_s15, 4  ;;  %s45_s18 = sshll.u32 %s710_s17, 4  ;;  %s23_s16 = int_to_ptr.vmem [resolvable:$true] %s22_s16  ;;  %s46_s18 = int_to_ptr.vmem [resolvable:$true] %s45_s18 }
  0x16   :  { %s610_s21 = scalar_lea.hbm %s863_s0, 64 }
  0x17   :  { %p611_p8 = scmp.ne.s32.totalorder %s863_s0, %s610_s21  ;;  %p614_p9 = scmp.lt.u32.totalorder %s610_s21, %s863_s0 }
  0x19   :  { %p616_p10 = pnand %p614_p9, %p611_p8 }
  0x1b   :  { %619 = shalt.err (!%p616_p10)
}
  0x1c   :  { %s620_s1 = scalar_lea.vmem %s23_s16, 64  ;;  %p625_p12 = scmp.lt.s32.totalorder %s23_s16, %s23_s16 }
  0x1d   :  { %p621_p11 = scmp.ne.s32.totalorder %s23_s16, %s620_s1  ;;  %p626_p13 = scmp.lt.s32.totalorder %s620_s1, %s620_s1 }
  0x1f   :  { %p627_p0 = por %p626_p13, %p625_p12 }
  0x21   :  { %p628_p1 = pnand %p627_p0, %p621_p11 }
  0x23   :  { %631 = shalt.err (!%p628_p1)
}
  0x24   :  { %25 = dma.hbm_to_vmem [thread:$0]  %s863_s0, 64, %s23_s16, [#allocation3]  }
  0x25   :  { %s632_s30 = scalar_lea.hbm %s866_s3, 1024 }
  0x26   :  { %p633_p2 = scmp.ne.s32.totalorder %s866_s3, %s632_s30  ;;  %p636_p3 = scmp.lt.u32.totalorder %s632_s30, %s866_s3 }
  0x28   :  { %p638_p4 = pnand %p636_p3, %p633_p2 }
  0x2a   :  { %641 = shalt.err (!%p638_p4)
}
  0x2b   :  { %s642_s14 = scalar_lea.vmem %s46_s18, 1024  ;;  %p647_p6 = scmp.lt.s32.totalorder %s46_s18, %s46_s18 }
  0x2c   :  { %p643_p5 = scmp.ne.s32.totalorder %s46_s18, %s642_s14  ;;  %p648_p7 = scmp.lt.s32.totalorder %s642_s14, %s642_s14 }
  0x2e   :  { %p649_p8 = por %p648_p7, %p647_p6 }
  0x30   :  { %p650_p9 = pnand %p649_p8, %p643_p5 }
  0x32   :  { %653 = shalt.err (!%p650_p9)
}
  0x33   :  { %51 = dma.hbm_to_vmem [thread:$0]  %s866_s3, 1024, %s46_s18, [#allocation6], %s707_s11, %s707_s11, %s708_s12  }
  0x34   :  { %s711_s16 = smov [#allocation8]   ;;  %s654_s21 = scalar_lea.hbm %s868_s5, 1024 }
  0x35   :  { %s59_s17 = sshll.u32 %s711_s16, 4  ;;  %p655_p10 = scmp.ne.s32.totalorder %s868_s5, %s654_s21  ;;  %s60_s17 = int_to_ptr.vmem [resolvable:$true] %s59_s17 }
  0x36   :  { %p658_p11 = scmp.lt.u32.totalorder %s654_s21, %s868_s5 }
  0x38   :  { %p660_p12 = pnand %p658_p11, %p655_p10 }
  0x3a   :  { %663 = shalt.err (!%p660_p12)
}
  0x3b   :  { %s664_s1 = scalar_lea.vmem %s60_s17, 1024  ;;  %p669_p0 = scmp.lt.s32.totalorder %s60_s17, %s60_s17 }
  0x3c   :  { %p665_p13 = scmp.ne.s32.totalorder %s60_s17, %s664_s1  ;;  %p670_p1 = scmp.lt.s32.totalorder %s664_s1, %s664_s1 }
  0x3e   :  { %p671_p2 = por %p670_p1, %p669_p0 }
  0x40   :  { %p672_p3 = pnand %p671_p2, %p665_p13 }
  0x42   :  { %675 = shalt.err (!%p672_p3)
}
  0x43   :  { %65 = dma.hbm_to_vmem [thread:$0]  %s868_s5, 1024, %s60_s17, [#allocation9], %s707_s11, %s707_s11, %s708_s12  }
  0x44   :  { %698 = dma.done.wait [#allocation3], 64  }
  0x45   :  { %699 = vsyncadd [#allocation3], 4294967232 }
  0x46   :  { %700 = dma.done.wait [#allocation6], 2048  }
  0x47   :  { %701 = vsyncadd [#allocation6], 4294965248 }
  0x48   :  { %702 = dma.done.wait [#allocation9], 1024  }
  0x49   :  { %703 = vsyncadd [#allocation9], 4294966272  ;;  %v712_v0 = vmov 0.0   ;;  %vm713_vm0 = vmmov 0   ;;  %v564_v1 = vld [vmem:[#allocation5] sm:$0xff]   ;;  %v565_v2 = vld [vmem:[#allocation5 + $0x8] sm:$0xff]  }
  0x4a   :  { %495 = vmatprep.subr.bf16.mxu0 %v712_v0  ;;  %511 = vmatprep.mubr.msk.bf16.mxu0 %vm713_vm0, %v712_v0  ;;  %v566_v3 = vld [vmem:[#allocation5 + $0x10] sm:$0xff]   ;;  %v572_v4 = vld [vmem:[#allocation7] sm:$0xff]   ;;  %v567_v5 = vld [vmem:[#allocation5 + $0x18] sm:$0xff]   ;;  %s714_s28 = smov [#allocation10]  }
  0x4b   :  { %515 = vmatprep.subr.bf16.mxu1 %v712_v0  ;;  %531 = vmatprep.mubr.msk.bf16.mxu1 %vm713_vm0, %v712_v0  ;;  %v573_v6 = vld [vmem:[#allocation7 + $0x8] sm:$0xff]   ;;  %v568_v7 = vld [vmem:[#allocation5 + $0x20] sm:$0xff]   ;;  %v574_v8 = vld [vmem:[#allocation7 + $0x10] sm:$0xff]   ;;  %s430_s29 = sshll.u32 %s714_s28, 4  ;;  %s431_s29 = int_to_ptr.vmem [resolvable:$true] %s430_s29 }
  0x4c   :  { %496 = vmatpush3.bf16.msra.mxu0 %v564_v1  ;;  %516 = vmatpush3.bf16.msra.mxu1 %v572_v4  ;;  %v569_v9 = vld [vmem:[#allocation5 + $0x28] sm:$0xff]   ;;  %v575_v10 = vld [vmem:[#allocation7 + $0x18] sm:$0xff]   ;;  %v570_v11 = vld [vmem:[#allocation5 + $0x30] sm:$0xff]   ;;  %p681_p5 = scmp.lt.s32.totalorder %s431_s29, %s431_s29 }
  0x4d   :  { %497 = vmatprep.subr.bf16.mxu0 %v712_v0  ;;  %517 = vmatprep.subr.bf16.mxu1 %v712_v0  ;;  %v576_v12 = vld [vmem:[#allocation7 + $0x20] sm:$0xff]   ;;  %v571_v13 = vld [vmem:[#allocation5 + $0x38] sm:$0xff]   ;;  %v577_v14 = vld [vmem:[#allocation7 + $0x28] sm:$0xff]  }
  0x4e   :  { %v81_v15 = vld [vmem:[#allocation2] sm:$0xf]  ;;  %v578_v16 = vld [vmem:[#allocation7 + $0x30] sm:$0xff]   ;;  %v580_v18 = vld [vmem:[#allocation8] sm:$0xff]  }
  0x4f   :  { %v579_v17 = vld [vmem:[#allocation7 + $0x38] sm:$0xff]   ;;  %v581_v19 = vld [vmem:[#allocation8 + $0x8] sm:$0xff]   ;;  %v582_v20 = vld [vmem:[#allocation8 + $0x10] sm:$0xff]  }
  0x50   :  { %498 = vmatpush3.bf16.msra.mxu0 %v565_v2  ;;  %518 = vmatpush3.bf16.msra.mxu1 %v573_v6  ;;  %v583_v21 = vld [vmem:[#allocation8 + $0x18] sm:$0xff]   ;;  %v584_v22 = vld [vmem:[#allocation8 + $0x20] sm:$0xff]   ;;  %v585_v23 = vld [vmem:[#allocation8 + $0x28] sm:$0xff]  }
  0x51   :  { %499 = vmatprep.subr.bf16.mxu0 %v712_v0  ;;  %519 = vmatprep.subr.bf16.mxu1 %v712_v0  ;;  %v441_v24 = vld [vmem:[%s865_s2] ss:$0 sm:$0xff]  ;;  %v586_v33 = vld [vmem:[#allocation8 + $0x30] sm:$0xff]  }
  0x52   :  { %v587_v34 = vld [vmem:[#allocation8 + $0x38] sm:$0xff]  }
  0x53   :  { %v450_v35 = vld [vmem:[%s867_s4] ss:$0 sm:$0xff]  ;;  %s676_s4 = scalar_lea.vmem %s431_s29, 128 }
  0x54   :  { %500 = vmatpush3.bf16.msra.mxu0 %v566_v3  ;;  %520 = vmatpush3.bf16.msra.mxu1 %v574_v8  ;;  %v459_v44 = vld [vmem:[%s869_s6] ss:$0 sm:$0xff]  ;;  %p677_p4 = scmp.ne.s32.totalorder %s431_s29, %s676_s4  ;;  %p682_p6 = scmp.lt.s32.totalorder %s676_s4, %s676_s4 }
  0x55   :  { %501 = vmatprep.subr.bf16.mxu0 %v712_v0  ;;  %521 = vmatprep.subr.bf16.mxu1 %v712_v0 }
  0x56   :  { %p683_p7 = por %p682_p6, %p681_p5 }
  0x58   :  { %502 = vmatpush3.bf16.msra.mxu0 %v567_v5  ;;  %522 = vmatpush3.bf16.msra.mxu1 %v575_v10  ;;  %p684_p8 = pnand %p683_p7, %p677_p4 }
  0x59   :  { %503 = vmatprep.subr.bf16.mxu0 %v712_v0  ;;  %523 = vmatprep.subr.bf16.mxu1 %v712_v0 }
  0x5c   :  { %504 = vmatpush3.bf16.msra.mxu0 %v568_v7  ;;  %524 = vmatpush3.bf16.msra.mxu1 %v576_v12 }
  0x5d   :  { %505 = vmatprep.subr.bf16.mxu0 %v712_v0  ;;  %525 = vmatprep.subr.bf16.mxu1 %v712_v0 }
  0x60   :  { %506 = vmatpush3.bf16.msra.mxu0 %v569_v9  ;;  %526 = vmatpush3.bf16.msra.mxu1 %v577_v14 }
  0x61   :  { %507 = vmatprep.subr.bf16.mxu0 %v712_v0  ;;  %527 = vmatprep.subr.bf16.mxu1 %v712_v0 }
  0x64   :  { %508 = vmatpush3.bf16.msra.mxu0 %v570_v11  ;;  %528 = vmatpush3.bf16.msra.mxu1 %v578_v16 }
  0x65   :  { %509 = vmatprep.subr.bf16.mxu0 %v712_v0  ;;  %529 = vmatprep.subr.bf16.mxu1 %v712_v0 }
  0x68   :  { %510 = vmatpush3.bf16.msra.mxu0 %v571_v13  ;;  %530 = vmatpush3.bf16.msra.mxu1 %v579_v17 }
  0x69   :  { %535 = vmatprep.subr.bf16.mxu0 %v712_v0 }
  0x6b   :  { %512 = vmatmul.mubr.bf16.vlgmr.msra.gmra.mrb[0].mxu0 %v81_v15 }
  0x6c   :  { %551 = vmatprep.mubr.msk.bf16.mxu0 %vm713_vm0, %v712_v0  ;;  %536 = vmatpush3.bf16.msra.mxu0 %v580_v18 }
  0x6d   :  { %537 = vmatprep.subr.bf16.mxu0 %v712_v0 }
  0x70   :  { %538 = vmatpush3.bf16.msra.mxu0 %v581_v19 }
  0x71   :  { %539 = vmatprep.subr.bf16.mxu0 %v712_v0 }
  0x74   :  { %540 = vmatpush3.bf16.msra.mxu0 %v582_v20 }
  0x75   :  { %541 = vmatprep.subr.bf16.mxu0 %v712_v0 }
  0x78   :  { %542 = vmatpush3.bf16.msra.mxu0 %v583_v21 }
  0x79   :  { %543 = vmatprep.subr.bf16.mxu0 %v712_v0 }
  0x7c   :  { %544 = vmatpush3.bf16.msra.mxu0 %v584_v22 }
  0x7d   :  { %545 = vmatprep.subr.bf16.mxu0 %v712_v0 }
  0x80   :  { %546 = vmatpush3.bf16.msra.mxu0 %v585_v23 }
  0x81   :  { %547 = vmatprep.subr.bf16.mxu0 %v712_v0 }
  0x84   :  { %548 = vmatpush3.bf16.msra.mxu0 %v586_v33 }
  0x85   :  { %549 = vmatprep.subr.bf16.mxu0 %v712_v0 }
  0x88   :  { %550 = vmatpush3.bf16.msra.mxu0 %v587_v34 }
 0x13e   :  { %v187_v25 = vpop.f32.mrb[0].mxu0 }
 0x13f   :  { %v188_v26 = vadd.f32 %v441_v24, %v187_v25  ;;  %v513_v27 = vpop.f32.mrb[1].mxu0 }
 0x140   :  { %v190_v28 = vpop.f32.mrb[2].mxu0 }
 0x141   :  { %vm193_vm1 = vcmp.ge.f32.partialorder %v188_v26, 0.0  ;;  %v194_v29 = vmul.f32 0.01, %v188_v26  ;;  %v514_v30 = vpop.f32.mrb[3].mxu0 }
 0x143   :  { %v195_v31 = vsel %vm193_vm1, %v188_v26, %v194_v29 }
 0x144   :  { %v196_v32 = vpack.c.bf16 %v195_v31, %v195_v31 }
 0x146   :  { %532 = vmatmul.mubr.bf16.vlgmr.msra.gmra.mrb[0].mxu1 %v196_v32 }
 0x219   :  { %v302_v36 = vpop.f32.mrb[0].mxu1 }
 0x21a   :  { %v303_v37 = vadd.f32 %v450_v35, %v302_v36  ;;  %v533_v38 = vpop.f32.mrb[1].mxu1 }
 0x21b   :  { %v305_v39 = vpop.f32.mrb[2].mxu1 }
 0x21c   :  { %vm308_vm2 = vcmp.ge.f32.partialorder %v303_v37, 0.0  ;;  %v309_v40 = vmul.f32 0.01, %v303_v37  ;;  %v534_v41 = vpop.f32.mrb[3].mxu1 }
 0x21e   :  { %v310_v42 = vsel %vm308_vm2, %v303_v37, %v309_v40 }
 0x21f   :  { %v311_v43 = vpack.c.bf16 %v310_v42, %v310_v42 }
 0x221   :  { %552 = vmatmul.mubr.bf16.vlgmr.msra.gmra.mrb[4].mxu0 %v311_v43 }
 0x2f4   :  { %v417_v45 = vpop.f32.mrb[4].mxu0 }
 0x2f5   :  { %v418_v46 = vadd.f32 %v459_v44, %v417_v45  ;;  %v553_v47 = vpop.f32.mrb[5].mxu0 }
 0x2f6   :  { %v420_v48 = vpop.f32.mrb[6].mxu0 }
 0x2f7   :  { %423 = vst [vmem:[#allocation10] sm:$0xff] %v418_v46  ;;  %v554_v49 = vpop.f32.mrb[7].mxu0 }
 0x2f8   :  { %687 = shalt.err (!%p684_p8)
}
 0x2f9   :  { %s688_s6 = scalar_lea.hbm %s870_s7, 128 }
 0x2fa   :  { %p689_p9 = scmp.ne.s32.totalorder %s870_s7, %s688_s6  ;;  %p692_p10 = scmp.lt.u32.totalorder %s688_s6, %s870_s7 }
 0x2fc   :  { %p694_p11 = pnand %p692_p10, %p689_p9 }
 0x2fe   :  { %697 = shalt.err (!%p694_p11)
}
 0x2ff   :  { %433 = dma.vmem_to_hbm [thread:$0]  %s431_s29, 128, %s870_s7, [#allocation4]  }
 0x300   :  { %704 = dma.done.wait [#allocation4], 128  }
 0x301   :  { %705 = vsyncadd [#allocation4], 4294967168 }
 0x302   :  { %437 = vsyncpa [#allocation3], 1 }
 0x303   :  { %438 = vsyncpa [#allocation6], 1 }
 0x304   :  { %439 = vsyncpa [#allocation9], 1 }
 0x305   :  { %440 = vsyncpa [#allocation4], 1 }

</bundles_post_ra>
